<compile_context>
chip_gen: v5e
topology: v5e:2x2
jax: 0.10.0
libtpu: 0.0.40
codegen_flags: <defaults>
</compile_context>

<pallas_src>
import math

import jax
import jax.numpy as jnp
from jax.experimental import pallas as pl
from jax.experimental.pallas import tpu as pltpu

# ---- small, module-consistent configuration -------------------------------
STATE_SIZE = 16
ACTION_SIZE = 8
SIGMA_EMBED_DIM = 16
HIDDEN_SIZES = [64, 32, 16]
BLOCKS_PER_LAYER = 1
LEAKY_SLOPE = 0.01            # torch.nn.LeakyReLU default negative_slope
COMPUTE_DTYPE = jnp.bfloat16  # MXU-native on v5e/v6e/v7x
DEFAULT_BATCH_TILE = 1024     # safe under v5e 16 MiB / v7x 32 MiB scoped VMEM

# TODO(synk): sigma_embedding_config is hydra-instantiated in the original
# module; here it is fixed to a deterministic sinusoidal embedding of width 16.


def _round_up(x, m):
    return (x + m - 1) // m * m


# ---- Pallas kernel: sigma embedding + full residual-MLP chain ---------------
def residual_mlp_kernel(state_ref, action_ref, sigma_ref, *refs):
    out_ref = refs[-1]
    p = refs[:-1]

    # Sinusoidal sigma embedding, computed in-kernel (EUP slot).
    half = SIGMA_EMBED_DIM // 2
    iota = jax.lax.broadcasted_iota(jnp.int32, (1, half), 1).astype(jnp.float32)
    freqs = jnp.exp(iota * (-math.log(10000.0) / (half - 1)))      # (1, half)
    args = sigma_ref[...].astype(jnp.float32) * freqs              # (TB, half)
    emb_sin = jnp.sin(args).astype(COMPUTE_DTYPE)
    emb_cos = jnp.cos(args).astype(COMPUTE_DTYPE)

    # First Linear, with its weight split into [state | action | sin | cos]
    # row blocks so the concat never materializes.
    w_s, w_a, w_sin, w_cos, b1 = p[0], p[1], p[2], p[3], p[4]
    h = (
        jnp.dot(state_ref[...], w_s[...], preferred_element_type=jnp.float32)
        + jnp.dot(action_ref[...], w_a[...], preferred_element_type=jnp.float32)
        + jnp.dot(emb_sin, w_sin[...], preferred_element_type=jnp.float32)
        + jnp.dot(emb_cos, w_cos[...], preferred_element_type=jnp.float32)
        + b1[...]
    )

    idx = 5

    def residual_block(h, idx):
        rw = p[idx][...]
        rb = p[idx + 1][...]
        t = (
            jnp.dot(h.astype(COMPUTE_DTYPE), rw, preferred_element_type=jnp.float32)
            + rb
        )
        # LeakyReLU(0<slope<1)  ==  max(t, slope*t)
        return h + jnp.maximum(t, LEAKY_SLOPE * t), idx + 2

    # Residual blocks of the first layer.
    for _ in range(BLOCKS_PER_LAYER):
        h, idx = residual_block(h, idx)

    # Remaining hidden layers.
    for _ in HIDDEN_SIZES[1:]:
        w = p[idx][...]
        b = p[idx + 1][...]
        idx += 2
        h = (
            jnp.dot(h.astype(COMPUTE_DTYPE), w, preferred_element_type=jnp.float32)
            + b
        )
        for _ in range(BLOCKS_PER_LAYER):
            h, idx = residual_block(h, idx)

    # Final Linear(hidden[-1], action_size).
    wo = p[idx][...]
    bo = p[idx + 1][...]
    out_ref[...] = (
        jnp.dot(h.astype(COMPUTE_DTYPE), wo, preferred_element_type=jnp.float32)
        + bo
    ).astype(out_ref.dtype)


def run_residual_mlp(state, action, sigma, kparams, batch_tile=DEFAULT_BATCH_TILE):
    B = state.shape[0]
    TB = min(batch_tile, _round_up(B, 8))
    Bp = _round_up(B, TB)
    if Bp != B:
        pad = Bp - B
        state = jnp.pad(state, ((0, pad), (0, 0)))
        action = jnp.pad(action, ((0, pad), (0, 0)))
        sigma = jnp.pad(sigma, ((0, pad), (0, 0)))

    grid = (Bp // TB,)

    def const_map(nd):
        return lambda i, _nd=nd: (0,) * _nd

    in_specs = [
        pl.BlockSpec((TB, STATE_SIZE), lambda i: (i, 0)),
        pl.BlockSpec((TB, ACTION_SIZE), lambda i: (i, 0)),
        pl.BlockSpec((TB, 1), lambda i: (i, 0)),
    ] + [pl.BlockSpec(p.shape, const_map(p.ndim)) for p in kparams]

    out = pl.pallas_call(
        residual_mlp_kernel,
        out_shape=jax.ShapeDtypeStruct((Bp, ACTION_SIZE), jnp.float32),
        grid=grid,
        in_specs=in_specs,
        out_specs=pl.BlockSpec((TB, ACTION_SIZE), lambda i: (i, 0)),
        compiler_params=pltpu.CompilerParams(
            dimension_semantics=("parallel",),
        ),
    )(state, action, sigma, *kparams)
    return out[:B]


# ---- parameter construction (deterministic, synthetic, f32 masters) --------
def init_params(key):
    input_size = STATE_SIZE + ACTION_SIZE + SIGMA_EMBED_DIM
    all_dims = [input_size] + list(HIDDEN_SIZES)
    params = []
    for din, dout in zip(all_dims[:-1], all_dims[1:]):
        key, kw, kb = jax.random.split(key, 3)
        params.append(jax.random.normal(kw, (din, dout), jnp.float32) / jnp.sqrt(din))
        params.append(jax.random.normal(kb, (1, dout), jnp.float32) * 0.01)
        for _ in range(BLOCKS_PER_LAYER):
            key, kw, kb = jax.random.split(key, 3)
            params.append(
                jax.random.normal(kw, (dout, dout), jnp.float32) / jnp.sqrt(dout)
            )
            params.append(jax.random.normal(kb, (1, dout), jnp.float32) * 0.01)
    key, kw, kb = jax.random.split(key, 3)
    params.append(
        jax.random.normal(kw, (HIDDEN_SIZES[-1], ACTION_SIZE), jnp.float32)
        / jnp.sqrt(HIDDEN_SIZES[-1])
    )
    params.append(jax.random.normal(kb, (1, ACTION_SIZE), jnp.float32) * 0.01)
    return params


def prepare_kernel_params(params_f32):
    """Split first-layer weight into [state|action|sin|cos] blocks and cast
    weights to bf16 (biases stay f32)."""
    half = SIGMA_EMBED_DIM // 2
    s0 = STATE_SIZE
    s1 = STATE_SIZE + ACTION_SIZE
    s2 = s1 + half
    w1 = params_f32[0].astype(COMPUTE_DTYPE)
    b1 = params_f32[1]
    out = [w1[:s0], w1[s0:s1], w1[s1:s2], w1[s2:], b1]
    rest = params_f32[2:]
    for j, p in enumerate(rest):
        out.append(p.astype(COMPUTE_DTYPE) if j % 2 == 0 else p)
    return out


# ---- full forward (matches the PyTorch module's forward) -------------------
def forward(state, noised_action, sigma, kernel_params, extra_inputs=None,
            batch_tile=DEFAULT_BATCH_TILE):
    del extra_inputs  # unused, matches original signature
    batch = state.shape[0]
    sigma = sigma.reshape(batch, -1).astype(jnp.float32)
    return run_residual_mlp(
        state.astype(COMPUTE_DTYPE),
        noised_action.astype(COMPUTE_DTYPE),
        sigma,
        kernel_params,
        batch_tile=batch_tile,
    )


# ---- pure-JAX reference (mirrors the kernel's bf16 matmul numerics) --------
def forward_ref(state, noised_action, sigma, params_f32):
    batch = state.shape[0]
    sigma = sigma.reshape(batch, -1).astype(jnp.float32)
    half = SIGMA_EMBED_DIM // 2
    freqs = jnp.exp(
        -math.log(10000.0) * jnp.arange(half, dtype=jnp.float32) / (half - 1)
    )
    args = sigma * freqs[None, :]
    emb = jnp.concatenate([jnp.sin(args), jnp.cos(args)], axis=-1)
    h = jnp.concatenate(
        [state.astype(jnp.float32), noised_action.astype(jnp.float32), emb], axis=-1
    )
    idx = 0
    for _ in HIDDEN_SIZES:
        w = params_f32[idx].astype(COMPUTE_DTYPE)
        b = params_f32[idx + 1]
        idx += 2
        h = jnp.dot(h.astype(COMPUTE_DTYPE), w, preferred_element_type=jnp.float32) + b
        for _ in range(BLOCKS_PER_LAYER):
            rw = params_f32[idx].astype(COMPUTE_DTYPE)
            rb = params_f32[idx + 1]
            idx += 2
            t = (
                jnp.dot(h.astype(COMPUTE_DTYPE), rw, preferred_element_type=jnp.float32)
                + rb
            )
            h = h + jnp.maximum(t, LEAKY_SLOPE * t)
    wo = params_f32[idx].astype(COMPUTE_DTYPE)
    bo = params_f32[idx + 1]
    return jnp.dot(h.astype(COMPUTE_DTYPE), wo, preferred_element_type=jnp.float32) + bo


if __name__ == "__main__":
    key = jax.random.PRNGKey(0)
    k_param, k_state, k_action, k_sigma = jax.random.split(key, 4)

    params_f32 = init_params(k_param)
    kernel_params = prepare_kernel_params(params_f32)

    batch = 8
    state = jax.random.normal(k_state, (batch, STATE_SIZE), jnp.float32)
    noised_action = jax.random.normal(k_action, (batch, ACTION_SIZE), jnp.float32)
    sigma = jax.random.uniform(k_sigma, (batch, 1), jnp.float32, 0.01, 1.0)

    out = forward(state, noised_action, sigma, kernel_params, extra_inputs={})
    out = jax.block_until_ready(out)

    ref = forward_ref(state, noised_action, sigma, params_f32)
    assert out.shape == (batch, ACTION_SIZE)
    assert jnp.allclose(out, ref, atol=2e-2, rtol=2e-2), (
        jnp.max(jnp.abs(out - ref))
    )

    print("KERNEL_OK")
</pallas_src>

<mosaic_0001>
module attributes {stable_mosaic.version = 11 : i64} {
  func.func @residual_mlp_kernel(%arg0: i32, %arg1: memref<8x16xbf16, #tpu.memory_space<vmem>>, %arg2: memref<8x8xbf16, #tpu.memory_space<vmem>>, %arg3: memref<8x1xf32, #tpu.memory_space<vmem>>, %arg4: memref<16x64xbf16, #tpu.memory_space<vmem>>, %arg5: memref<8x64xbf16, #tpu.memory_space<vmem>>, %arg6: memref<8x64xbf16, #tpu.memory_space<vmem>>, %arg7: memref<8x64xbf16, #tpu.memory_space<vmem>>, %arg8: memref<1x64xf32, #tpu.memory_space<vmem>>, %arg9: memref<64x64xbf16, #tpu.memory_space<vmem>>, %arg10: memref<1x64xf32, #tpu.memory_space<vmem>>, %arg11: memref<64x32xbf16, #tpu.memory_space<vmem>>, %arg12: memref<1x32xf32, #tpu.memory_space<vmem>>, %arg13: memref<32x32xbf16, #tpu.memory_space<vmem>>, %arg14: memref<1x32xf32, #tpu.memory_space<vmem>>, %arg15: memref<32x16xbf16, #tpu.memory_space<vmem>>, %arg16: memref<1x16xf32, #tpu.memory_space<vmem>>, %arg17: memref<16x16xbf16, #tpu.memory_space<vmem>>, %arg18: memref<1x16xf32, #tpu.memory_space<vmem>>, %arg19: memref<16x8xbf16, #tpu.memory_space<vmem>>, %arg20: memref<1x8xf32, #tpu.memory_space<vmem>>, %arg21: memref<8x8xf32, #tpu.memory_space<vmem>>) attributes {dimension_semantics = [#tpu.dimension_semantics<parallel>], iteration_bounds = array<i64: 1>, scalar_prefetch = 0 : i64, scratch_operands = 0 : i64, tpu.core_type = #tpu.core_type<tc>, window_params = [{transform_indices = @transform_0, window_bounds = array<i64: 8, 16>}, {transform_indices = @transform_1, window_bounds = array<i64: 8, 8>}, {transform_indices = @transform_2, window_bounds = array<i64: 8, 1>}, {pipeline_mode = #tpu.pipeline_mode<synchronous>, transform_indices = @transform_3, window_bounds = array<i64: 16, 64>}, {pipeline_mode = #tpu.pipeline_mode<synchronous>, transform_indices = @transform_4, window_bounds = array<i64: 8, 64>}, {pipeline_mode = #tpu.pipeline_mode<synchronous>, transform_indices = @transform_5, window_bounds = array<i64: 8, 64>}, {pipeline_mode = #tpu.pipeline_mode<synchronous>, transform_indices = @transform_6, window_bounds = array<i64: 8, 64>}, {pipeline_mode = #tpu.pipeline_mode<synchronous>, transform_indices = @transform_7, window_bounds = array<i64: 1, 64>}, {pipeline_mode = #tpu.pipeline_mode<synchronous>, transform_indices = @transform_8, window_bounds = array<i64: 64, 64>}, {pipeline_mode = #tpu.pipeline_mode<synchronous>, transform_indices = @transform_9, window_bounds = array<i64: 1, 64>}, {pipeline_mode = #tpu.pipeline_mode<synchronous>, transform_indices = @transform_10, window_bounds = array<i64: 64, 32>}, {pipeline_mode = #tpu.pipeline_mode<synchronous>, transform_indices = @transform_11, window_bounds = array<i64: 1, 32>}, {pipeline_mode = #tpu.pipeline_mode<synchronous>, transform_indices = @transform_12, window_bounds = array<i64: 32, 32>}, {pipeline_mode = #tpu.pipeline_mode<synchronous>, transform_indices = @transform_13, window_bounds = array<i64: 1, 32>}, {pipeline_mode = #tpu.pipeline_mode<synchronous>, transform_indices = @transform_14, window_bounds = array<i64: 32, 16>}, {pipeline_mode = #tpu.pipeline_mode<synchronous>, transform_indices = @transform_15, window_bounds = array<i64: 1, 16>}, {pipeline_mode = #tpu.pipeline_mode<synchronous>, transform_indices = @transform_16, window_bounds = array<i64: 16, 16>}, {pipeline_mode = #tpu.pipeline_mode<synchronous>, transform_indices = @transform_17, window_bounds = array<i64: 1, 16>}, {pipeline_mode = #tpu.pipeline_mode<synchronous>, transform_indices = @transform_18, window_bounds = array<i64: 16, 8>}, {pipeline_mode = #tpu.pipeline_mode<synchronous>, transform_indices = @transform_19, window_bounds = array<i64: 1, 8>}, {transform_indices = @transform_20, window_bounds = array<i64: 8, 8>}]} {
    %0 = tpu.iota {dimensions = array<i32: 1>} : vector<1x8xi32>
    %1 = arith.sitofp %0 : vector<1x8xi32> to vector<1x8xf32>
    %cst = arith.constant -1.31576288 : f32
    %2 = vector.broadcast %cst : f32 to vector<1x8xf32>
    %3 = arith.mulf %1, %2 : vector<1x8xf32>
    %4 = math.exp %3 : vector<1x8xf32>
    %c0 = arith.constant 0 : index
    %c0_0 = arith.constant 0 : index
    %5 = vector.load %arg3[%c0, %c0_0] : memref<8x1xf32, #tpu.memory_space<vmem>>, vector<8x1xf32>
    %6 = vector.broadcast %5 : vector<8x1xf32> to vector<8x8xf32>
    %7 = vector.broadcast %4 : vector<1x8xf32> to vector<8x8xf32>
    %8 = arith.mulf %6, %7 : vector<8x8xf32>
    %9 = math.sin %8 : vector<8x8xf32>
    %10 = arith.truncf %9 : vector<8x8xf32> to vector<8x8xbf16>
    %11 = math.cos %8 : vector<8x8xf32>
    %12 = arith.truncf %11 : vector<8x8xf32> to vector<8x8xbf16>
    %c0_1 = arith.constant 0 : index
    %c0_2 = arith.constant 0 : index
    %13 = vector.load %arg1[%c0_1, %c0_2] : memref<8x16xbf16, #tpu.memory_space<vmem>>, vector<8x16xbf16>
    %c0_3 = arith.constant 0 : index
    %c0_4 = arith.constant 0 : index
    %14 = vector.load %arg4[%c0_3, %c0_4] : memref<16x64xbf16, #tpu.memory_space<vmem>>, vector<16x64xbf16>
    %cst_5 = arith.constant dense<0.000000e+00> : vector<8x64xf32>
    %15 = tpu.matmul %13, %14, %cst_5 {dimension_numbers = #tpu.dot_dimension_numbers<[1], [0], [0], [1], [0, 0, 1, 1], [], []>} : vector<8x16xbf16>, vector<16x64xbf16>, vector<8x64xf32> -> vector<8x64xf32>
    %c0_6 = arith.constant 0 : index
    %c0_7 = arith.constant 0 : index
    %16 = vector.load %arg2[%c0_6, %c0_7] : memref<8x8xbf16, #tpu.memory_space<vmem>>, vector<8x8xbf16>
    %c0_8 = arith.constant 0 : index
    %c0_9 = arith.constant 0 : index
    %17 = vector.load %arg5[%c0_8, %c0_9] : memref<8x64xbf16, #tpu.memory_space<vmem>>, vector<8x64xbf16>
    %cst_10 = arith.constant dense<0.000000e+00> : vector<8x64xf32>
    %18 = tpu.matmul %16, %17, %cst_10 {dimension_numbers = #tpu.dot_dimension_numbers<[1], [0], [0], [1], [0, 0, 1, 1], [], []>} : vector<8x8xbf16>, vector<8x64xbf16>, vector<8x64xf32> -> vector<8x64xf32>
    %19 = arith.addf %15, %18 : vector<8x64xf32>
    %c0_11 = arith.constant 0 : index
    %c0_12 = arith.constant 0 : index
    %20 = vector.load %arg6[%c0_11, %c0_12] : memref<8x64xbf16, #tpu.memory_space<vmem>>, vector<8x64xbf16>
    %cst_13 = arith.constant dense<0.000000e+00> : vector<8x64xf32>
    %21 = tpu.matmul %10, %20, %cst_13 {dimension_numbers = #tpu.dot_dimension_numbers<[1], [0], [0], [1], [0, 0, 1, 1], [], []>} : vector<8x8xbf16>, vector<8x64xbf16>, vector<8x64xf32> -> vector<8x64xf32>
    %22 = arith.addf %19, %21 : vector<8x64xf32>
    %c0_14 = arith.constant 0 : index
    %c0_15 = arith.constant 0 : index
    %23 = vector.load %arg7[%c0_14, %c0_15] : memref<8x64xbf16, #tpu.memory_space<vmem>>, vector<8x64xbf16>
    %cst_16 = arith.constant dense<0.000000e+00> : vector<8x64xf32>
    %24 = tpu.matmul %12, %23, %cst_16 {dimension_numbers = #tpu.dot_dimension_numbers<[1], [0], [0], [1], [0, 0, 1, 1], [], []>} : vector<8x8xbf16>, vector<8x64xbf16>, vector<8x64xf32> -> vector<8x64xf32>
    %25 = arith.addf %22, %24 : vector<8x64xf32>
    %c0_17 = arith.constant 0 : index
    %c0_18 = arith.constant 0 : index
    %26 = vector.load %arg8[%c0_17, %c0_18] : memref<1x64xf32, #tpu.memory_space<vmem>>, vector<1x64xf32>
    %27 = vector.broadcast %26 : vector<1x64xf32> to vector<8x64xf32>
    %28 = arith.addf %25, %27 : vector<8x64xf32>
    %c0_19 = arith.constant 0 : index
    %c0_20 = arith.constant 0 : index
    %29 = vector.load %arg9[%c0_19, %c0_20] : memref<64x64xbf16, #tpu.memory_space<vmem>>, vector<64x64xbf16>
    %c0_21 = arith.constant 0 : index
    %c0_22 = arith.constant 0 : index
    %30 = vector.load %arg10[%c0_21, %c0_22] : memref<1x64xf32, #tpu.memory_space<vmem>>, vector<1x64xf32>
    %31 = arith.truncf %28 : vector<8x64xf32> to vector<8x64xbf16>
    %cst_23 = arith.constant dense<0.000000e+00> : vector<8x64xf32>
    %32 = tpu.matmul %31, %29, %cst_23 {dimension_numbers = #tpu.dot_dimension_numbers<[1], [0], [0], [1], [0, 0, 1, 1], [], []>} : vector<8x64xbf16>, vector<64x64xbf16>, vector<8x64xf32> -> vector<8x64xf32>
    %33 = vector.broadcast %30 : vector<1x64xf32> to vector<8x64xf32>
    %34 = arith.addf %32, %33 : vector<8x64xf32>
    %cst_24 = arith.constant 0.00999999977 : f32
    %35 = vector.broadcast %cst_24 : f32 to vector<8x64xf32>
    %36 = arith.mulf %35, %34 : vector<8x64xf32>
    %37 = arith.maximumf %34, %36 : vector<8x64xf32>
    %38 = arith.addf %28, %37 : vector<8x64xf32>
    %c0_25 = arith.constant 0 : index
    %c0_26 = arith.constant 0 : index
    %39 = vector.load %arg11[%c0_25, %c0_26] : memref<64x32xbf16, #tpu.memory_space<vmem>>, vector<64x32xbf16>
    %c0_27 = arith.constant 0 : index
    %c0_28 = arith.constant 0 : index
    %40 = vector.load %arg12[%c0_27, %c0_28] : memref<1x32xf32, #tpu.memory_space<vmem>>, vector<1x32xf32>
    %41 = arith.truncf %38 : vector<8x64xf32> to vector<8x64xbf16>
    %cst_29 = arith.constant dense<0.000000e+00> : vector<8x32xf32>
    %42 = tpu.matmul %41, %39, %cst_29 {dimension_numbers = #tpu.dot_dimension_numbers<[1], [0], [0], [1], [0, 0, 1, 1], [], []>} : vector<8x64xbf16>, vector<64x32xbf16>, vector<8x32xf32> -> vector<8x32xf32>
    %43 = vector.broadcast %40 : vector<1x32xf32> to vector<8x32xf32>
    %44 = arith.addf %42, %43 : vector<8x32xf32>
    %c0_30 = arith.constant 0 : index
    %c0_31 = arith.constant 0 : index
    %45 = vector.load %arg13[%c0_30, %c0_31] : memref<32x32xbf16, #tpu.memory_space<vmem>>, vector<32x32xbf16>
    %c0_32 = arith.constant 0 : index
    %c0_33 = arith.constant 0 : index
    %46 = vector.load %arg14[%c0_32, %c0_33] : memref<1x32xf32, #tpu.memory_space<vmem>>, vector<1x32xf32>
    %47 = arith.truncf %44 : vector<8x32xf32> to vector<8x32xbf16>
    %cst_34 = arith.constant dense<0.000000e+00> : vector<8x32xf32>
    %48 = tpu.matmul %47, %45, %cst_34 {dimension_numbers = #tpu.dot_dimension_numbers<[1], [0], [0], [1], [0, 0, 1, 1], [], []>} : vector<8x32xbf16>, vector<32x32xbf16>, vector<8x32xf32> -> vector<8x32xf32>
    %49 = vector.broadcast %46 : vector<1x32xf32> to vector<8x32xf32>
    %50 = arith.addf %48, %49 : vector<8x32xf32>
    %cst_35 = arith.constant 0.00999999977 : f32
    %51 = vector.broadcast %cst_35 : f32 to vector<8x32xf32>
    %52 = arith.mulf %51, %50 : vector<8x32xf32>
    %53 = arith.maximumf %50, %52 : vector<8x32xf32>
    %54 = arith.addf %44, %53 : vector<8x32xf32>
    %c0_36 = arith.constant 0 : index
    %c0_37 = arith.constant 0 : index
    %55 = vector.load %arg15[%c0_36, %c0_37] : memref<32x16xbf16, #tpu.memory_space<vmem>>, vector<32x16xbf16>
    %c0_38 = arith.constant 0 : index
    %c0_39 = arith.constant 0 : index
    %56 = vector.load %arg16[%c0_38, %c0_39] : memref<1x16xf32, #tpu.memory_space<vmem>>, vector<1x16xf32>
    %57 = arith.truncf %54 : vector<8x32xf32> to vector<8x32xbf16>
    %cst_40 = arith.constant dense<0.000000e+00> : vector<8x16xf32>
    %58 = tpu.matmul %57, %55, %cst_40 {dimension_numbers = #tpu.dot_dimension_numbers<[1], [0], [0], [1], [0, 0, 1, 1], [], []>} : vector<8x32xbf16>, vector<32x16xbf16>, vector<8x16xf32> -> vector<8x16xf32>
    %59 = vector.broadcast %56 : vector<1x16xf32> to vector<8x16xf32>
    %60 = arith.addf %58, %59 : vector<8x16xf32>
    %c0_41 = arith.constant 0 : index
    %c0_42 = arith.constant 0 : index
    %61 = vector.load %arg17[%c0_41, %c0_42] : memref<16x16xbf16, #tpu.memory_space<vmem>>, vector<16x16xbf16>
    %c0_43 = arith.constant 0 : index
    %c0_44 = arith.constant 0 : index
    %62 = vector.load %arg18[%c0_43, %c0_44] : memref<1x16xf32, #tpu.memory_space<vmem>>, vector<1x16xf32>
    %63 = arith.truncf %60 : vector<8x16xf32> to vector<8x16xbf16>
    %cst_45 = arith.constant dense<0.000000e+00> : vector<8x16xf32>
    %64 = tpu.matmul %63, %61, %cst_45 {dimension_numbers = #tpu.dot_dimension_numbers<[1], [0], [0], [1], [0, 0, 1, 1], [], []>} : vector<8x16xbf16>, vector<16x16xbf16>, vector<8x16xf32> -> vector<8x16xf32>
    %65 = vector.broadcast %62 : vector<1x16xf32> to vector<8x16xf32>
    %66 = arith.addf %64, %65 : vector<8x16xf32>
    %cst_46 = arith.constant 0.00999999977 : f32
    %67 = vector.broadcast %cst_46 : f32 to vector<8x16xf32>
    %68 = arith.mulf %67, %66 : vector<8x16xf32>
    %69 = arith.maximumf %66, %68 : vector<8x16xf32>
    %70 = arith.addf %60, %69 : vector<8x16xf32>
    %c0_47 = arith.constant 0 : index
    %c0_48 = arith.constant 0 : index
    %71 = vector.load %arg19[%c0_47, %c0_48] : memref<16x8xbf16, #tpu.memory_space<vmem>>, vector<16x8xbf16>
    %c0_49 = arith.constant 0 : index
    %c0_50 = arith.constant 0 : index
    %72 = vector.load %arg20[%c0_49, %c0_50] : memref<1x8xf32, #tpu.memory_space<vmem>>, vector<1x8xf32>
    %73 = arith.truncf %70 : vector<8x16xf32> to vector<8x16xbf16>
    %cst_51 = arith.constant dense<0.000000e+00> : vector<8x8xf32>
    %74 = tpu.matmul %73, %71, %cst_51 {dimension_numbers = #tpu.dot_dimension_numbers<[1], [0], [0], [1], [0, 0, 1, 1], [], []>} : vector<8x16xbf16>, vector<16x8xbf16>, vector<8x8xf32> -> vector<8x8xf32>
    %75 = vector.broadcast %72 : vector<1x8xf32> to vector<8x8xf32>
    %76 = arith.addf %74, %75 : vector<8x8xf32>
    %c0_52 = arith.constant 0 : index
    %c0_53 = arith.constant 0 : index
    %77 = vector.load %arg21[%c0_52, %c0_53] : memref<8x8xf32, #tpu.memory_space<vmem>>, vector<8x8xf32>
    tpu.vector_store %arg21[%c0_52, %c0_53], %76 {strides = array<i32>} : memref<8x8xf32, #tpu.memory_space<vmem>>, vector<8x8xf32>,
    return
  }
  func.func @transform_0(%arg0: i32) -> (i32, i32) {
    %c0_i32 = arith.constant 0 : i32
    %c0_i32_0 = arith.constant 0 : i32
    return %arg0, %c0_i32 : i32, i32
  }
  func.func @transform_1(%arg0: i32) -> (i32, i32) {
    %c0_i32 = arith.constant 0 : i32
    %c0_i32_0 = arith.constant 0 : i32
    return %arg0, %c0_i32 : i32, i32
  }
  func.func @transform_2(%arg0: i32) -> (i32, i32) {
    %c0_i32 = arith.constant 0 : i32
    %c0_i32_0 = arith.constant 0 : i32
    return %arg0, %c0_i32 : i32, i32
  }
  func.func @transform_3(%arg0: i32) -> (i32, i32) {
    %c0_i32 = arith.constant 0 : i32
    %c0_i32_0 = arith.constant 0 : i32
    %c0_i32_1 = arith.constant 0 : i32
    return %c0_i32, %c0_i32_0 : i32, i32
  }
  func.func @transform_4(%arg0: i32) -> (i32, i32) {
    %c0_i32 = arith.constant 0 : i32
    %c0_i32_0 = arith.constant 0 : i32
    %c0_i32_1 = arith.constant 0 : i32
    return %c0_i32, %c0_i32_0 : i32, i32
  }
  func.func @transform_5(%arg0: i32) -> (i32, i32) {
    %c0_i32 = arith.constant 0 : i32
    %c0_i32_0 = arith.constant 0 : i32
    %c0_i32_1 = arith.constant 0 : i32
    return %c0_i32, %c0_i32_0 : i32, i32
  }
  func.func @transform_6(%arg0: i32) -> (i32, i32) {
    %c0_i32 = arith.constant 0 : i32
    %c0_i32_0 = arith.constant 0 : i32
    %c0_i32_1 = arith.constant 0 : i32
    return %c0_i32, %c0_i32_0 : i32, i32
  }
  func.func @transform_7(%arg0: i32) -> (i32, i32) {
    %c0_i32 = arith.constant 0 : i32
    %c0_i32_0 = arith.constant 0 : i32
    %c0_i32_1 = arith.constant 0 : i32
    return %c0_i32, %c0_i32_0 : i32, i32
  }
  func.func @transform_8(%arg0: i32) -> (i32, i32) {
    %c0_i32 = arith.constant 0 : i32
    %c0_i32_0 = arith.constant 0 : i32
    %c0_i32_1 = arith.constant 0 : i32
    return %c0_i32, %c0_i32_0 : i32, i32
  }
  func.func @transform_9(%arg0: i32) -> (i32, i32) {
    %c0_i32 = arith.constant 0 : i32
    %c0_i32_0 = arith.constant 0 : i32
    %c0_i32_1 = arith.constant 0 : i32
    return %c0_i32, %c0_i32_0 : i32, i32
  }
  func.func @transform_10(%arg0: i32) -> (i32, i32) {
    %c0_i32 = arith.constant 0 : i32
    %c0_i32_0 = arith.constant 0 : i32
    %c0_i32_1 = arith.constant 0 : i32
    return %c0_i32, %c0_i32_0 : i32, i32
  }
  func.func @transform_11(%arg0: i32) -> (i32, i32) {
    %c0_i32 = arith.constant 0 : i32
    %c0_i32_0 = arith.constant 0 : i32
    %c0_i32_1 = arith.constant 0 : i32
    return %c0_i32, %c0_i32_0 : i32, i32
  }
  func.func @transform_12(%arg0: i32) -> (i32, i32) {
    %c0_i32 = arith.constant 0 : i32
    %c0_i32_0 = arith.constant 0 : i32
    %c0_i32_1 = arith.constant 0 : i32
    return %c0_i32, %c0_i32_0 : i32, i32
  }
  func.func @transform_13(%arg0: i32) -> (i32, i32) {
    %c0_i32 = arith.constant 0 : i32
    %c0_i32_0 = arith.constant 0 : i32
    %c0_i32_1 = arith.constant 0 : i32
    return %c0_i32, %c0_i32_0 : i32, i32
  }
  func.func @transform_14(%arg0: i32) -> (i32, i32) {
    %c0_i32 = arith.constant 0 : i32
    %c0_i32_0 = arith.constant 0 : i32
    %c0_i32_1 = arith.constant 0 : i32
    return %c0_i32, %c0_i32_0 : i32, i32
  }
  func.func @transform_15(%arg0: i32) -> (i32, i32) {
    %c0_i32 = arith.constant 0 : i32
    %c0_i32_0 = arith.constant 0 : i32
    %c0_i32_1 = arith.constant 0 : i32
    return %c0_i32, %c0_i32_0 : i32, i32
  }
  func.func @transform_16(%arg0: i32) -> (i32, i32) {
    %c0_i32 = arith.constant 0 : i32
    %c0_i32_0 = arith.constant 0 : i32
    %c0_i32_1 = arith.constant 0 : i32
    return %c0_i32, %c0_i32_0 : i32, i32
  }
  func.func @transform_17(%arg0: i32) -> (i32, i32) {
    %c0_i32 = arith.constant 0 : i32
    %c0_i32_0 = arith.constant 0 : i32
    %c0_i32_1 = arith.constant 0 : i32
    return %c0_i32, %c0_i32_0 : i32, i32
  }
  func.func @transform_18(%arg0: i32) -> (i32, i32) {
    %c0_i32 = arith.constant 0 : i32
    %c0_i32_0 = arith.constant 0 : i32
    %c0_i32_1 = arith.constant 0 : i32
    return %c0_i32, %c0_i32_0 : i32, i32
  }
  func.func @transform_19(%arg0: i32) -> (i32, i32) {
    %c0_i32 = arith.constant 0 : i32
    %c0_i32_0 = arith.constant 0 : i32
    %c0_i32_1 = arith.constant 0 : i32
    return %c0_i32, %c0_i32_0 : i32, i32
  }
  func.func @transform_20(%arg0: i32) -> (i32, i32) {
    %c0_i32 = arith.constant 0 : i32
    %c0_i32_0 = arith.constant 0 : i32
    return %arg0, %c0_i32 : i32, i32
  }
}

</mosaic_0001>

<bundles_post_ra>
// kernel: tpu_custom_call.1
= control target key start
LH: loop header
LB: loop body
LE: loop exit
PB: predicated region body
PF: predicated region fallthrough
CT: control target
= control target key end

     0   :  { %s1328_s0 = inlined_call_operand.hbm [shape: bf16[8,16], index: 0, kind: input, shape index: {}]   ;;  %s1329_s1 = inlined_call_operand.hbm [shape: bf16[8,8], index: 1, kind: input, shape index: {}]   ;;  %s1330_s2 = inlined_call_operand.vmem [shape: f32[8,1], index: 2, kind: input, shape index: {}]   ;;  %s1331_s3 = inlined_call_operand.vmem [shape: bf16[16,64], index: 3, kind: input, shape index: {}]   ;;  %s1332_s4 = inlined_call_operand.hbm [shape: bf16[8,64], index: 4, kind: input, shape index: {}]   ;;  %s1333_s5 = inlined_call_operand.hbm [shape: bf16[8,64], index: 5, kind: input, shape index: {}]   ;;  %s1334_s6 = inlined_call_operand.vmem [shape: bf16[8,64], index: 6, kind: input, shape index: {}]   ;;  %s1335_s7 = inlined_call_operand.vmem [shape: f32[1,64], index: 7, kind: input, shape index: {}]   ;;  %s1336_s8 = inlined_call_operand.vmem [shape: bf16[64,64], index: 8, kind: input, shape index: {}]   ;;  %s1337_s9 = inlined_call_operand.vmem [shape: f32[1,64], index: 9, kind: input, shape index: {}]   ;;  %s1338_s10 = inlined_call_operand.vmem [shape: bf16[64,32], index: 10, kind: input, shape index: {}]   ;;  %s1339_s11 = inlined_call_operand.vmem [shape: f32[1,32], index: 11, kind: input, shape index: {}]   ;;  %s1340_s12 = inlined_call_operand.vmem [shape: bf16[32,32], index: 12, kind: input, shape index: {}]   ;;  %s1341_s13 = inlined_call_operand.vmem [shape: f32[1,32], index: 13, kind: input, shape index: {}]   ;;  %s1342_s14 = inlined_call_operand.vmem [shape: bf16[32,16], index: 14, kind: input, shape index: {}]   ;;  %s1343_s15 = inlined_call_operand.vmem [shape: f32[1,16], index: 15, kind: input, shape index: {}]   ;;  %s1344_s16 = inlined_call_operand.vmem [shape: bf16[16,16], index: 16, kind: input, shape index: {}]   ;;  %s1345_s17 = inlined_call_operand.vmem [shape: f32[1,16], index: 17, kind: input, shape index: {}]   ;;  %s1346_s18 = inlined_call_operand.vmem [shape: bf16[16,8], index: 18, kind: input, shape index: {}]   ;;  %s1347_s19 = inlined_call_operand.vmem [shape: f32[1,8], index: 19, kind: input, shape index: {}]   ;;  %s1348_s20 = inlined_call_operand.hbm [shape: f32[8,8], index: 20, kind: output, shape index: {}]  }
   0x1   :  { %1349 = sst [smem:[#allocation15_spill]] %s1328_s0 }
   0x2   :  { %1350 = sst [smem:[#allocation16_spill]] %s1329_s1 }
   0x3   :  { %1351 = sst [smem:[#allocation17_spill]] %s1330_s2 }
   0x4   :  { %1352 = sst [smem:[#allocation18_spill]] %s1331_s3 }
   0x5   :  { %1353 = sst [smem:[#allocation19_spill]] %s1332_s4 }
   0x6   :  { %1354 = sst [smem:[#allocation20_spill]] %s1347_s19 }
   0x7   :  { %1355 = sst [smem:[#allocation21_spill]] %s1348_s20 }
   0x8   :  { %25 = vsyncpa [#allocation3], 0 }
   0x9   :  { %26 = vsyncpa [#allocation6], 0 }
   0xa   :  { %27 = vsyncpa [#allocation9], 0  ;;  %s1356_s23 = sld [smem:[#allocation16_spill]] }
  0x10   :  { %s45_s24 = sshll.u32 %s1356_s23, 4  ;;  %s46_s24 = int_to_ptr.hbm [resolvable:$true] %s45_s24 }
  0x11   :  { %28 = vsyncpa [#allocation4], 0  ;;  %s1052_s2 = smov [#allocation5]   ;;  %s1357_s27 = sld [smem:[#allocation15_spill]] }
  0x12   :  { %s47_s25 = sshll.u32 %s1052_s2, 4  ;;  %s1053_s4 = smov [#allocation2]   ;;  %s48_s25 = int_to_ptr.vmem [resolvable:$true] %s47_s25 }
  0x13   :  { %50 = dma.hbm_to_vmem [thread:$0]  %s46_s24, 64, %s48_s25, [#allocation6]  }
  0x14   :  { %s36_s29 = sshll.u32 %s1053_s4, 4  ;;  %s1358_s21 = sld [smem:[#allocation19_spill]]  ;;  %s37_s29 = int_to_ptr.vmem [resolvable:$true] %s36_s29 }
  0x15   :  { %s71_s23 = sshll.u32 %s1333_s5, 4  ;;  %s1054_s2 = smov [#allocation7]   ;;  %s72_s23 = int_to_ptr.hbm [resolvable:$true] %s71_s23 }
  0x16   :  { %s62_s19 = sshll.u32 %s1054_s2, 4  ;;  %s1055_s24 = smov [#allocation8]   ;;  %s63_s19 = int_to_ptr.vmem [resolvable:$true] %s62_s19 }
  0x17   :  { %s34_s28 = sshll.u32 %s1357_s27, 4  ;;  %s73_s25 = sshll.u32 %s1055_s24, 4  ;;  %s35_s28 = int_to_ptr.hbm [resolvable:$true] %s34_s28  ;;  %s74_s25 = int_to_ptr.vmem [resolvable:$true] %s73_s25 }
  0x18   :  { %39 = dma.hbm_to_vmem [thread:$0]  %s35_s28, 64, %s37_s29, [#allocation3]  }
  0x19   :  { %76 = dma.hbm_to_vmem [thread:$0]  %s72_s23, 64, %s74_s25, [#allocation9]  }
  0x1a   :  { %s60_s20 = sshll.u32 %s1358_s21, 4  ;;  %s61_s20 = int_to_ptr.hbm [resolvable:$true] %s60_s20 }
  0x1b   :  { %65 = dma.hbm_to_vmem [thread:$0]  %s61_s20, 64, %s63_s19, [#allocation6]  }
  0x1c   :  { %1044 = dma.done.wait [#allocation3], 64  }
  0x1d   :  { %1045 = vsyncadd [#allocation3], 4294967232 }
  0x1e   :  { %1046 = dma.done.wait [#allocation6], 128  }
  0x1f   :  { %1047 = vsyncadd [#allocation6], 4294967168 }
  0x20   :  { %1048 = dma.done.wait [#allocation9], 64  }
  0x21   :  { %1049 = vsyncadd [#allocation9], 4294967232  ;;  %v1056_v0 = vmov 0   ;;  %s1359_s26 = sld [smem:[#allocation17_spill]]  ;;  %v122_v2 = vlaneseq  ;;  %v450_v10 = vld [vmem:[#allocation7] sm:$0xf] }
  0x22   :  { %914 = vset.pattern.permute.xlu0 %v1056_v0  ;;  %vm455_vm0 = vcmask 1043456   ;;  %s1360_s27 = sld [smem:[#allocation18_spill]]  ;;  %v449_v14 = vld [vmem:[#allocation5] sm:$0xf]  ;;  %vm451_vm1 = vcmask 64512   ;;  %vm478_vm2 = vcmask 130048  }
  0x23   :  { %v123_v3 = vand.u32 127, %v122_v2  ;;  %v457_v13 = vsel %vm455_vm0, %v450_v10, 0  ;;  %v446_v15 = vld [vmem:[#allocation2] sm:$0xf]  ;;  %v495_v16 = vld [vmem:[#allocation8] sm:$0xf] }
  0x24   :  { %466 = vmatpush.bf16.msra.mxu0 %v457_v13  ;;  %v500_v18 = vsel %vm455_vm0, %v495_v16, 0  ;;  %v516_v19 = vld [vmem:[%s1334_s6] sm:$0xf]  ;;  %v1057_v30 = vmov 683565275   ;;  %s1361_s5 = sld [smem:[#allocation20_spill]] }
  0x25   :  { %v124_v4 = vcvt.s32.f32 %v123_v3  ;;  %509 = vmatpush.bf16.msra.mxu2 %v500_v18  ;;  %v521_v20 = vsel %vm455_vm0, %v516_v19, 0  ;;  %v1058_v32 = vmov 2475754826   ;;  %v1059_v35 = vmov 2131351028  }
  0x26   :  { %530 = vmatpush.bf16.msra.mxu3 %v521_v20  ;;  %v1060_v38 = vmov 2102212464   ;;  %v1061_v41 = vmov 920167782   ;;  %v1062_v44 = vmov 1326507024  }
  0x27   :  { %v128_v1 = vld [vmem:[%s1359_s26] sm:$0xff]  ;;  %v125_v5 = vmul.f32 -1.3157629, %v124_v4  ;;  %817 = vmatmul.msk.bf16.vlgmr.msra.gmra.mxu0 %vm451_vm1, %v449_v14  ;;  %s1063_s26 = smov [#allocation10]  }
  0x28   :  { %131 = vperm.xlu0 %914, %v128_v1   ;;  %v887_v11 = vld [vmem:[%s1360_s27] sm:$0xff]  ;;  %s1362_s27 = sld [smem:[#allocation21_spill]] }
  0x29   :  { %v126_v6 = vmul.f32 1.442695, %v125_v5  ;;  %489 = vmatpush.bf16.msra.mxu1 %v887_v11 }
  0x2b   :  { %922 = vpow2.f32 %v126_v6 }
  0x2c   :  { %822 = vmatmul.msk.bf16.vlgmr.msra.gmra.mxu1 %vm478_vm2, %v446_v15 }
  0x2e   :  { %s799_s28 = sshll.u32 %s1362_s27, 4  ;;  %s800_s28 = int_to_ptr.hbm [resolvable:$true] %s799_s28 }
  0x31   :  { %v923_v7 = vpop.eup %922 }
  0x9a   :  { %v132_v8 = vpop.permute.xlu0 %131 }
  0x9b   :  { %v1185_v9 = vmul.f32 %v923_v7, %v132_v8 }
  0x9d   :  { %v138_v12 = vand.u32 2139095040, %v1185_v9  ;;  %v135_v22 = vand.u32 2147483647, %v1185_v9  ;;  %vm137_vm15 = vcmp.lt.s32.totalorder %v1185_v9, 0 }
  0x9f   :  { %v139_v17 = vshrl.u32 %v138_v12, 23  ;;  %v142_v24 = vand.u32 8388607, %v135_v22  ;;  %vm136_vm0 = vcmp.le.f32.partialorder %v135_v22, 0.7853982 }
  0xa1   :  { %v811_v21 = vadd.s32 4294967169, %v139_v17  ;;  %v143_v28 = vor.u32 8388608, %v142_v24 }
  0xa3   :  { %v145_v23 = vadd.s32 1, %v811_v21  ;;  %v1210_v51 = vshll.u32 %v143_v28, 8 }
  0xa5   :  { %vm146_vm3 = vcmp.gt.s32.totalorder %v145_v23, 0  ;;  %v184_v60 = vand.u32 65535, %v1210_v51  ;;  %v185_v61 = vshrl.u32 %v1210_v51, 16 }
  0xa6   :  { %v147_v25 = vsel %vm146_vm3, %v145_v23, 0 }
  0xa7   :  { %v149_v26 = vand.u32 31, %v147_v25  ;;  %v1201_v29 = vshrl.u32 %v147_v25, 5 }
  0xa9   :  { %v1199_v27 = vsub.s32 32, %v149_v26  ;;  %v152_v31 = vshll.u32 %v1057_v30, %v149_v26  ;;  %v155_v33 = vshll.u32 %v1058_v32, %v149_v26  ;;  %v158_v37 = vshll.u32 %v1059_v35, %v149_v26 }
  0xaa   :  { %v161_v40 = vshll.u32 %v1060_v38, %v149_v26  ;;  %v164_v43 = vshll.u32 %v1061_v41, %v149_v26  ;;  %vm167_vm4 = vcmp.lt.s32.totalorder %v1201_v29, 1  ;;  %vm170_vm5 = vcmp.lt.s32.totalorder %v1201_v29, 4 }
  0xab   :  { %v153_v34 = vshrl.u32 %v1058_v32, %v1199_v27  ;;  %v156_v36 = vshrl.u32 %v1059_v35, %v1199_v27  ;;  %v159_v39 = vshrl.u32 %v1060_v38, %v1199_v27  ;;  %v162_v42 = vshrl.u32 %v1061_v41, %v1199_v27 }
  0xac   :  { %v165_v45 = vshrl.u32 %v1062_v44, %v1199_v27  ;;  %vm169_vm6 = vcmp.lt.s32.totalorder %v1201_v29, 3  ;;  %vm168_vm7 = vcmp.lt.s32.totalorder %v1201_v29, 2  ;;  %v151_v25 = vshrl.u32 %v1057_v30, %v1199_v27 }
  0xad   :  { %v154_v46 = vor.u32 %v153_v34, %v152_v31  ;;  %v157_v47 = vor.u32 %v156_v36, %v155_v33  ;;  %v160_v48 = vor.u32 %v159_v39, %v158_v37  ;;  %v163_v49 = vor.u32 %v162_v42, %v161_v40 }
  0xae   :  { %v166_v50 = vor.u32 %v165_v45, %v164_v43 }
  0xaf   :  { %v175_v52 = vsel %vm167_vm4, %v154_v46, %v157_v47  ;;  %v179_v53 = vsel %vm167_vm4, %v157_v47, %v160_v48  ;;  %v176_v54 = vsel %vm170_vm5, %v163_v49, 920167782  ;;  %v172_v21 = vsel %vm170_vm5, %v160_v48, 2102212464 }
  0xb0   :  { %v180_v55 = vsel %vm170_vm5, %v166_v50, 1326507024  ;;  %v177_v56 = vsel %vm169_vm6, %v160_v48, %v176_v54  ;;  %v171_v34 = vsel %vm167_vm4, %v151_v25, %v154_v46  ;;  %v173_v35 = vsel %vm169_vm6, %v157_v47, %v172_v21 }
  0xb1   :  { %v181_v57 = vsel %vm169_vm6, %v163_v49, %v180_v55  ;;  %v178_v58 = vsel %vm168_vm7, %v175_v52, %v177_v56  ;;  %v174_v27 = vsel %vm168_vm7, %v171_v34, %v173_v35 }
  0xb2   :  { %v182_v59 = vsel %vm168_vm7, %v179_v53, %v181_v57  ;;  %v208_v1 = vand.u32 65535, %v178_v58  ;;  %v209_v2 = vshrl.u32 %v178_v58, 16  ;;  %v228_v42 = vmul.u32 %v1210_v51, %v174_v27  ;;  %v890_v27 = vld [vmem:[%s1336_s8 + $0x10] sm:$0xff] }
  0xb3   :  { %v186_v62 = vand.u32 65535, %v182_v59  ;;  %v187_v63 = vshrl.u32 %v182_v59, 16 }
  0xb4   :  { %v211_v5 = vmul.u32 %v209_v2, %v184_v60  ;;  %v212_v6 = vmul.u32 %v208_v1, %v185_v61  ;;  %v210_v11 = vmul.u32 %v208_v1, %v184_v60  ;;  %v213_v15 = vmul.u32 %v209_v2, %v185_v61 }
  0xb5   :  { %v189_v3 = vmul.u32 %v187_v63, %v184_v60  ;;  %v190_v4 = vmul.u32 %v186_v62, %v185_v61  ;;  %v188_v7 = vmul.u32 %v186_v62, %v184_v60  ;;  %v191_v10 = vmul.u32 %v187_v63, %v185_v61 }
  0xb6   :  { %v214_v12 = vshll.u32 %v211_v5, 16  ;;  %v216_v17 = vshll.u32 %v212_v6, 16  ;;  %v215_v32 = vshrl.u32 %v211_v5, 16  ;;  %v217_v38 = vshrl.u32 %v212_v6, 16 }
  0xb7   :  { %v192_v8 = vshll.u32 %v189_v3, 16  ;;  %v194_v13 = vshll.u32 %v190_v4, 16  ;;  %v193_v26 = vshrl.u32 %v189_v3, 16  ;;  %v195_v36 = vshrl.u32 %v190_v4, 16 }
  0xb8   :  { %vm218_vm9 = vc.u32 %v210_v11, %v214_v12  ;;  %v220_v18 = vadd.s32 %v214_v12, %v210_v11 }
  0xb9   :  { %vm196_vm8 = vc.u32 %v188_v7, %v192_v8  ;;  %v198_v14 = vadd.s32 %v192_v8, %v188_v7  ;;  %v219_v20 = vsel %vm218_vm9, 1, %v1056_v0  ;;  %vm278_vm9 = vweird.f32 %v1185_v9 }
  0xba   :  { %v197_v16 = vsel %vm196_vm8, 1, %v1056_v0  ;;  %v221_v23 = vadd.s32 %v219_v20, %v213_v15  ;;  %vm222_vm11 = vc.u32 %v220_v18, %v216_v17  ;;  %v224_v41 = vadd.s32 %v220_v18, %v216_v17 }
  0xbb   :  { %v199_v19 = vadd.s32 %v197_v16, %v191_v10  ;;  %vm200_vm10 = vc.u32 %v198_v14, %v194_v13  ;;  %v223_v31 = vsel %vm222_vm11, 1, %v1056_v0  ;;  %vm673_vm11 = vcmask 261120  }
  0xbc   :  { %v201_v24 = vsel %vm200_vm10, 1, %v1056_v0  ;;  %v225_v33 = vadd.s32 %v223_v31, %v221_v23  ;;  %vm579_vm10 = vcmask 523264  }
  0xbd   :  { %v203_v28 = vadd.s32 %v201_v24, %v199_v19 }
  0xbe   :  { %v226_v39 = vadd.s32 %v225_v33, %v215_v32 }
  0xbf   :  { %v204_v37 = vadd.s32 %v203_v28, %v193_v26 }
  0xc0   :  { %v227_v30 = vadd.s32 %v226_v39, %v217_v38 }
  0xc1   :  { %v205_v40 = vadd.s32 %v204_v37, %v195_v36 }
  0xc2   :  { %v231_v0 = vadd.s32 1, %v227_v30 }
  0xc3   :  { %vm230_vm12 = vc.u32 %v205_v40, %v224_v41  ;;  %v229_v29 = vadd.s32 %v224_v41, %v205_v40  ;;  %v891_v41 = vld [vmem:[%s1336_s8 + $0x18] sm:$0xff] }
  0xc4   :  { %v232_v43 = vsel %vm230_vm12, %v231_v0, %v227_v30  ;;  %587 = vmatpush.bf16.msrb.mxu0 %v891_v41  ;;  %v491_v30 = vpop.f32.mrf.mxu1 }
  0xc5   :  { %v233_v44 = vadd.s32 %v232_v43, %v228_v42 }
  0xc7   :  { %v234_v45 = vadd.s32 536870912, %v233_v44 }
  0xc8   :  { %588 = vmatpush.bf16.msrb.mxu0 %v890_v27 }
  0xc9   :  { %v235_v46 = vshrl.u32 %v234_v45, 30  ;;  %v888_v45 = vld [vmem:[%s1336_s8] sm:$0xff] }
  0xcb   :  { %v236_v48 = vshll.u32 %v235_v46, 30  ;;  %v259_v4 = vsub.s32 4, %v235_v46 }
  0xcc   :  { %v493_v43 = vpop.f32.mrf.mxu1 }
  0xcd   :  { %v237_v47 = vsub.s32 %v233_v44, %v236_v48  ;;  %v260_v10 = vsel %vm137_vm15, %v259_v4, %v235_v46  ;;  %v889_v44 = vld [vmem:[%s1336_s8 + $0x8] sm:$0xff]  ;;  %v895_v46 = vld [vmem:[%s1338_s10 + $0x18] sm:$0xff]  ;;  %v894_v48 = vld [vmem:[%s1338_s10 + $0x10] sm:$0xff]  ;;  %s797_s8 = sshll.u32 %s1063_s26, 4  ;;  %s798_s8 = int_to_ptr.vmem [resolvable:$true] %s797_s8 }
  0xce   :  { %v262_v13 = vsel %vm136_vm0, 0, %v260_v10  ;;  %589 = vmatpush.bf16.msrb.mxu0 %v889_v44  ;;  %643 = vmatpush.bf16.msrb.mxu1 %v895_v46 }
  0xcf   :  { %vm238_vm13 = vcmp.lt.s32.totalorder %v237_v47, 0  ;;  %v239_v49 = vsub.s32 0, %v237_v47  ;;  %v279_v18 = vadd.s32 3, %v262_v13  ;;  %v435_v23 = vand.u32 3, %v262_v13  ;;  %v900_v13 = vld [vmem:[%s1344_s16] sm:$0xff] }
  0xd1   :  { %v240_v50 = vsel %vm238_vm13, %v239_v49, %v237_v47  ;;  %v280_v24 = vand.u32 3, %v279_v18  ;;  %vm436_vm3 = vcmp.lt.s32.totalorder %v435_v23, 2  ;;  %vm437_vm4 = vcmp.eq.s32.totalorder %v435_v23, 0 }
  0xd2   :  { %v241_v52 = vclz %v240_v50  ;;  %vm440_vm8 = vcmp.eq.s32.totalorder %v435_v23, 2  ;;  %590 = vmatpush.bf16.msrb.mxu0 %v888_v45  ;;  %644 = vmatpush.bf16.msrb.mxu1 %v894_v48  ;;  %v919_v23 = vld [vmem:[%s1343_s15] ss:$0 sm:$0xff] }
  0xd3   :  { %vm281_vm5 = vcmp.lt.s32.totalorder %v280_v24, 2  ;;  %vm282_vm6 = vcmp.eq.s32.totalorder %v280_v24, 0  ;;  %vm285_vm7 = vcmp.eq.s32.totalorder %v280_v24, 2 }
  0xd4   :  { %v812_v53 = vadd.s32 4294967294, %v241_v52  ;;  %v915_v52 = vld [vmem:[%s1335_s7] ss:$0 sm:$0xff] }
  0xd6   :  { %vm813_vm14 = vcmp.lt.s32.totalorder %v812_v53, 0  ;;  %753 = vmatpush.bf16.msra.mxu0 %v900_v13 }
  0xd7   :  { %v244_v54 = vsel %vm813_vm14, 0, %v812_v53 }
  0xd8   :  { %v245_v55 = vsub.s32 32, %v244_v54  ;;  %v249_v56 = vsub.s32 4294967266, %v244_v54  ;;  %v246_v57 = vshll.u32 %v237_v47, %v244_v54 }
  0xda   :  { %v247_v58 = vshrl.u32 %v229_v29, %v245_v55  ;;  %v250_v59 = vadd.s32 127, %v249_v56 }
  0xdc   :  { %v248_v51 = vor.u32 %v247_v58, %v246_v57  ;;  %v251_v60 = vshll.u32 %v250_v59, 23  ;;  %v893_v57 = vld [vmem:[%s1338_s10 + $0x8] sm:$0xff]  ;;  %v892_v58 = vld [vmem:[%s1338_s10] sm:$0xff] }
  0xdd   :  { %645 = vmatpush.bf16.msrb.mxu1 %v893_v57  ;;  %v897_v59 = vld [vmem:[%s1340_s12 + $0x8] sm:$0xff] }
  0xde   :  { %v252_v61 = vor.u32 4788187, %v251_v60  ;;  %v255_v63 = vcvt.s32.f32 %v248_v51  ;;  %683 = vmatpush.bf16.msrb.mxu2 %v897_v59  ;;  %v896_v51 = vld [vmem:[%s1340_s12] sm:$0xff] }
  0xdf   :  { %v916_v60 = vld [vmem:[%s1337_s9] ss:$0 sm:$0xff] }
  0xe0   :  { %v253_v62 = vand.u32 2147483647, %v252_v61 }
  0xe1   :  { %646 = vmatpush.bf16.msrb.mxu1 %v892_v58 }
  0xe2   :  { %v256_v1 = vmul.f32 %v255_v63, %v253_v62  ;;  %684 = vmatpush.bf16.msrb.mxu2 %v896_v51 }
  0xe4   :  { %v257_v2 = vxor.u32 2147483648, %v256_v1 }
  0xe6   :  { %v258_v3 = vsel %vm137_vm15, %v257_v2, %v256_v1 }
  0xe7   :  { %v261_v5 = vsel %vm136_vm0, %v1185_v9, %v258_v3  ;;  %v468_v9 = vpop.f32.mrf.mxu0 }
  0xe8   :  { %v263_v6 = vmul.f32 %v261_v5, %v261_v5  ;;  %v492_v0 = vadd.f32 %v491_v30, %v468_v9 }
  0xea   :  { %v264_v7 = vmul.f32 -0.001358992, %v263_v6  ;;  %v271_v8 = vmul.f32 -0.00019511016, %v263_v6 }
  0xec   :  { %v265_v11 = vadd.f32 0.041655596, %v264_v7  ;;  %v272_v12 = vadd.f32 0.008332121, %v271_v8 }
  0xee   :  { %v266_v14 = vmul.f32 %v265_v11, %v263_v6  ;;  %v273_v15 = vmul.f32 %v272_v12, %v263_v6  ;;  %v898_v12 = vld [vmem:[%s1342_s14] sm:$0xff] }
  0xef   :  { %v470_v42 = vpop.f32.mrf.mxu0 }
  0xf0   :  { %v267_v16 = vadd.f32 -0.4999988, %v266_v14  ;;  %v274_v17 = vadd.f32 -0.16666654, %v273_v15  ;;  %v918_v14 = vld [vmem:[%s1341_s13] ss:$0 sm:$0xff] }
  0xf2   :  { %v268_v19 = vmul.f32 %v267_v16, %v263_v6  ;;  %v275_v20 = vmul.f32 %v274_v17, %v263_v6  ;;  %v917_v6 = vld [vmem:[%s1339_s11] ss:$0 sm:$0xff] }
  0xf4   :  { %v269_v21 = vadd.f32 1.0, %v268_v19  ;;  %v276_v22 = vadd.f32 1.0, %v275_v20 }
  0xf6   :  { %v277_v25 = vmul.f32 %v276_v22, %v261_v5  ;;  %v286_v26 = vxor.u32 2147483648, %v269_v21  ;;  %v899_v5 = vld [vmem:[%s1342_s14 + $0x8] sm:$0xff]  ;;  %v901_v22 = vld [vmem:[%s1346_s18] sm:$0xff] }
  0xf7   :  { %723 = vmatpush.bf16.msrb.mxu3 %v899_v5  ;;  %785 = vmatpush.bf16.msra.mxu1 %v901_v22 }
  0xf8   :  { %v283_v28 = vxor.u32 2147483648, %v277_v25  ;;  %v287_v32 = vsel %vm285_vm7, %v286_v26, %v277_v25  ;;  %v442_v34 = vsel %vm440_vm8, %v286_v26, %v277_v25 }
  0xfa   :  { %v284_v31 = vsel %vm282_vm6, %v269_v21, %v283_v28  ;;  %v439_v33 = vsel %vm437_vm4, %v269_v21, %v283_v28 }
  0xfb   :  { %v288_v35 = vsel %vm281_vm5, %v284_v31, %v287_v32  ;;  %v443_v36 = vsel %vm436_vm3, %v439_v33, %v442_v34  ;;  %724 = vmatpush.bf16.msrb.mxu3 %v898_v12  ;;  %v920_v31 = vld [vmem:[%s1345_s17] ss:$0 sm:$0xff] }
  0xfc   :  { %v289_v37 = vsel %vm278_vm9, nan, %v288_v35  ;;  %v444_v38 = vsel %vm278_vm9, nan, %v443_v36 }
  0xfd   :  { %v290_v39 = vpack.c.bf16 %v289_v37, %v289_v37  ;;  %v445_v40 = vpack.c.bf16 %v444_v38, %v444_v38 }
  0xff   :  { %823 = vmatmul.msk.bf16.vlgmr.msra.gmra.mxu2 %vm451_vm1, %v290_v39  ;;  %824 = vmatmul.msk.bf16.vlgmr.msra.gmra.mxu3 %vm451_vm1, %v445_v40  ;;  %v921_v39 = vld [vmem:[%s1361_s5] ss:$0 sm:$0xff] }
 0x182   :  { %v511_v47 = vpop.f32.mrf.mxu2  ;;  %v532_v49 = vpop.f32.mrf.mxu3 }
 0x183   :  { %v515_v50 = vadd.f32 %v511_v47, %v492_v0 }
 0x185   :  { %v536_v53 = vadd.f32 %v532_v49, %v515_v50 }
 0x187   :  { %v541_v54 = vadd.f32 %v915_v52, %v536_v53 }
 0x189   :  { %v551_v29 = vpack.c.bf16 %v541_v54, %v541_v54 }
 0x18a   :  { %v513_v55 = vpop.f32.mrf.mxu2  ;;  %v534_v56 = vpop.f32.mrf.mxu3 }
 0x18b   :  { %841 = vmatmul.msk.bf16.vlgmr.msrb.gmra.mxu0 %vm579_vm10, %v551_v29 }
 0x208   :  { %v592_v61 = vpop.f32.mrf.mxu0 }
 0x209   :  { %v593_v62 = vadd.f32 %v916_v60, %v592_v61 }
 0x20b   :  { %v596_v63 = vmul.f32 0.01, %v593_v62 }
 0x20d   :  { %v597_v1 = vmax.f32 %v593_v62, %v596_v63 }
 0x20f   :  { %v598_v2 = vadd.f32 %v597_v1, %v541_v54 }
 0x210   :  { %v594_v3 = vpop.f32.mrf.mxu0 }
 0x211   :  { %v608_v4 = vpack.c.bf16 %v598_v2, %v598_v2 }
 0x213   :  { %858 = vmatmul.msk.bf16.vlgmr.msrb.gmra.mxu1 %vm579_vm10, %v608_v4 }
 0x290   :  { %v648_v7 = vpop.f32.mrf.mxu1 }
 0x291   :  { %v649_v8 = vadd.f32 %v917_v6, %v648_v7 }
 0x293   :  { %v657_v10 = vpack.c.bf16 %v649_v8, %v649_v8 }
 0x295   :  { %867 = vmatmul.msk.bf16.vlgmr.msrb.gmra.mxu2 %vm673_vm11, %v657_v10 }
 0x298   :  { %v650_v11 = vpop.f32.mrf.mxu1 }
 0x318   :  { %v686_v15 = vpop.f32.mrf.mxu2 }
 0x319   :  { %v687_v16 = vadd.f32 %v918_v14, %v686_v15 }
 0x31b   :  { %v690_v17 = vmul.f32 0.01, %v687_v16 }
 0x31d   :  { %v691_v18 = vmax.f32 %v687_v16, %v690_v17 }
 0x31f   :  { %v692_v19 = vadd.f32 %v691_v18, %v649_v8 }
 0x320   :  { %v688_v20 = vpop.f32.mrf.mxu2 }
 0x321   :  { %v698_v21 = vpack.c.bf16 %v692_v19, %v692_v19 }
 0x323   :  { %876 = vmatmul.msk.bf16.vlgmr.msrb.gmra.mxu3 %vm673_vm11, %v698_v21 }
 0x3a6   :  { %v726_v24 = vpop.f32.mrf.mxu3 }
 0x3a7   :  { %v727_v25 = vadd.f32 %v919_v23, %v726_v24 }
 0x3a9   :  { %v733_v26 = vpack.c.bf16 %v727_v25, %v727_v25 }
 0x3ab   :  { %881 = vmatmul.msk.bf16.vlgmr.msra.gmra.mxu0 %vm478_vm2, %v733_v26 }
 0x3ae   :  { %v728_v28 = vpop.f32.mrf.mxu3 }
 0x428   :  { %v755_v32 = vpop.f32.mrf.mxu0 }
 0x429   :  { %v756_v33 = vadd.f32 %v920_v31, %v755_v32 }
 0x42b   :  { %v759_v34 = vmul.f32 0.01, %v756_v33 }
 0x42d   :  { %v760_v35 = vmax.f32 %v756_v33, %v759_v34 }
 0x42f   :  { %v761_v36 = vadd.f32 %v760_v35, %v727_v25 }
 0x430   :  { %v757_v37 = vpop.f32.mrf.mxu0 }
 0x431   :  { %v765_v38 = vpack.c.bf16 %v761_v36, %v761_v36 }
 0x433   :  { %886 = vmatmul.msk.bf16.vlgmr.msra.gmra.mxu1 %vm478_vm2, %v765_v38 }
 0x4b0   :  { %v787_v40 = vpop.f32.mrf.mxu1 }
 0x4b1   :  { %v788_v41 = vadd.f32 %v921_v39, %v787_v40 }
 0x4b3   :  { %791 = vst.msk [vmem:[#allocation10] sm:$0xff] %vm451_vm1, %v788_v41 }
 0x4b4   :  { %802 = dma.vmem_to_hbm [thread:$0]  %s798_s8, 128, %s800_s28, [#allocation4]  }
 0x4b8   :  { %v789_v27 = vpop.f32.mrf.mxu1 }
 0x4b9   :  { %1050 = dma.done.wait [#allocation4], 128  }
 0x4ba   :  { %1051 = vsyncadd [#allocation4], 4294967168 }
 0x4bb   :  { %807 = vsyncpa [#allocation3], 1 }
 0x4bc   :  { %808 = vsyncpa [#allocation6], 1 }
 0x4bd   :  { %809 = vsyncpa [#allocation9], 1 }
 0x4be   :  { %810 = vsyncpa [#allocation4], 1 }

</bundles_post_ra>
